<compile_context>
chip_gen: v6e
topology: v6e:2x2x1
jax: 0.10.0
libtpu: 0.0.40
codegen_flags: <defaults>
</compile_context>

<pallas_src>
import functools
import math

import jax
import jax.numpy as jnp
import numpy as np
from jax.experimental import pallas as pl
from jax.experimental.pallas import tpu as pltpu


_NEG_LARGE = -1e30  # finite "-inf" (keeps the online lse free of inf-inf NaNs)


# --------------------------------------------------------------------------
# Kernels
# --------------------------------------------------------------------------
def _fused_output_kernel(x_ref, w_ref, b_ref, o_ref, acc_ref, *,
                         groups_per_tile, last, accum_bf16):
    """Linear (+bias) with a tile-local grouped log_softmax epilogue.

    x_ref: (tb, tk); w_ref: (tk, tn) -- weight already (in, out) so the MXU
    contraction needs no transpose; b_ref: (1, tn); o_ref: (tb, tn);
    acc_ref: (tb, tn) f32 accumulator resident across the k grid axis.
    Every output tile contains whole softmax groups (tn % last == 0).
    """
    k = pl.program_id(2)

    @pl.when(k == 0)
    def _():
        acc_ref[...] = jnp.zeros_like(acc_ref)

    a = x_ref[...]
    w = w_ref[...]
    if accum_bf16:
        a = a.astype(jnp.bfloat16)
        w = w.astype(jnp.bfloat16)
    acc_ref[...] += jnp.dot(a, w, preferred_element_type=jnp.float32)

    @pl.when(k == pl.num_programs(2) - 1)
    def _():
        h = acc_ref[...] + b_ref[...].astype(jnp.float32)
        tb, tn = h.shape
        if groups_per_tile == 1:
            # Softmax group == whole tile: reduce directly over the lane dim.
            m = jnp.max(h, axis=-1, keepdims=True)
            z = h - m
            lse = jnp.log(jnp.sum(jnp.exp(z), axis=-1, keepdims=True))
            o_ref[...] = (z - lse).astype(o_ref.dtype)
        else:
            # TODO(synk): for last < 128 a pltpu.roll butterfly on the lane
            # axis would avoid this (tb, g, last) relayout; the epilogue is
            # amortized over the K sweep so the reshape is kept for clarity.
            hr = h.reshape(tb, groups_per_tile, last)
            m = jnp.max(hr, axis=-1, keepdims=True)
            z = hr - m
            lse = jnp.log(jnp.sum(jnp.exp(z), axis=-1, keepdims=True))
            o_ref[...] = (z - lse).reshape(tb, tn).astype(o_ref.dtype)


def _logits_lse_kernel(x_ref, w_ref, b_ref, h_ref, lse_ref,
                       acc_ref, m_ref, l_ref, *, accum_bf16):
    """Pass 1 of the two-pass (wide softmax / vocab) path.

    Tiled matmul + bias writes f32 logits tiles and keeps an online
    (running max, running sum-of-exp) logsumexp per row in (tb, 1) f32 VMEM
    scratch resident across the (j, k) axes of the current batch tile.
    """
    j = pl.program_id(1)
    k = pl.program_id(2)
    nj = pl.num_programs(1)
    nk = pl.num_programs(2)

    @pl.when(k == 0)
    def _():
        acc_ref[...] = jnp.zeros_like(acc_ref)

    @pl.when(jnp.logical_and(j == 0, k == 0))
    def _():
        m_ref[...] = jnp.full_like(m_ref, _NEG_LARGE)
        l_ref[...] = jnp.zeros_like(l_ref)

    a = x_ref[...]
    w = w_ref[...]
    if accum_bf16:
        a = a.astype(jnp.bfloat16)
        w = w.astype(jnp.bfloat16)
    acc_ref[...] += jnp.dot(a, w, preferred_element_type=jnp.float32)

    @pl.when(k == nk - 1)
    def _():
        h = acc_ref[...] + b_ref[...].astype(jnp.float32)
        h_ref[...] = h
        m_prev = m_ref[...]
        m_new = jnp.maximum(m_prev, jnp.max(h, axis=-1, keepdims=True))
        l_ref[...] = (l_ref[...] * jnp.exp(m_prev - m_new)
                      + jnp.sum(jnp.exp(h - m_new), axis=-1, keepdims=True))
        m_ref[...] = m_new

    @pl.when(jnp.logical_and(j == nj - 1, k == nk - 1))
    def _():
        lse_ref[...] = m_ref[...] + jnp.log(l_ref[...])


def _subtract_lse_kernel(h_ref, lse_ref, o_ref):
    """Pass 2: log_softmax = logits - lse, cast to the output dtype."""
    o_ref[...] = (h_ref[...] - lse_ref[...]).astype(o_ref.dtype)


# --------------------------------------------------------------------------
# Tile picking / budgeting helpers
# --------------------------------------------------------------------------
def _pick_tile(dim, preferred, alignments=(256, 128, 8)):
    """Largest t <= preferred dividing `dim`, preferring coarse alignments."""
    if dim <= preferred:
        return dim
    for align in alignments:
        t = (preferred // align) * align
        while t >= align:
            if dim % t == 0:
                return t
            t -= align
    return dim


def _pick_group_tile(flat_out, last, preferred):
    """Whole-softmax-group output tile (tn % last == 0), lane-dense when possible.

    Returns None when no multiple of `last` <= preferred divides flat_out.
    """
    if flat_out <= preferred:
        return flat_out
    lane_align = last * 128 // math.gcd(last, 128)
    for align in (lane_align, last):
        t = (preferred // align) * align
        while t >= align:
            if flat_out % t == 0:
                return t
            t -= align
    return None


def _pick_div_tile(total, preferred, align):
    """Largest multiple of `align` <= preferred dividing total (total % align == 0)."""
    t = min((max(preferred, align) // align) * align, total)
    while t > align and total % t != 0:
        t -= align
    return t


def _vmem_capacity_bytes():
    """Physical VMEM of the local TPU; conservative 64 MiB (v7x) if unknown."""
    try:
        info = pltpu.get_tpu_info()
        for attr in ("vmem_capacity_bytes", "vmem_bytes", "vmem_size_bytes"):
            v = getattr(info, attr, None)
            if v:
                return int(v)
    except Exception:
        pass
    return 64 * 1024 * 1024


# --------------------------------------------------------------------------
# Wrapper
# --------------------------------------------------------------------------
def output_layer_forward(x, weight, bias, output_shape, *,
                         tb_pref=512, tn_pref=512, tk_pref=1024,
                         max_group_tile=1024, accum_bf16=False,
                         weight_transposed=False):
    """x: (B, in_features); weight: (out, in) (nn.Linear layout); bias: (out,)."""
    if not isinstance(output_shape, (list, tuple)):
        output_shape = [output_shape]
    output_shape = tuple(int(s) for s in output_shape)
    flat_out = int(np.prod(output_shape))
    last = output_shape[-1]

    B, F = x.shape
    # Pre-transpose the weight once so the kernel's MXU contraction is a plain
    # A @ B with no in-loop XLU transpose.
    # TODO(synk): in a real model, store the weight as (in, out) at init time.
    w_t = weight if weight_transposed else jnp.transpose(weight)
    assert w_t.shape == (F, flat_out)
    assert bias.shape == (flat_out,)
    assert flat_out % last == 0

    in_isz = jnp.dtype(x.dtype).itemsize
    w_isz = jnp.dtype(w_t.dtype).itemsize
    out_dtype = x.dtype
    out_isz = jnp.dtype(out_dtype).itemsize
    use_bf16 = bool(accum_bf16) and x.dtype == jnp.float32

    cap = _vmem_capacity_bytes()
    tile_budget = int(cap * 0.45)       # headroom for double-buffer + Mosaic scratch
    vmem_ceiling = int(cap * 0.8)       # ~102 MiB on v5e/v6e, ~51 MiB on v7x

    # ---- choose path & N tile ------------------------------------------------
    two_pass = False
    tn = None
    if last <= max_group_tile:
        tn = _pick_group_tile(flat_out, last, max(tn_pref, last))
    if tn is None:
        if last == flat_out:
            two_pass = True             # wide 1-group (vocab) softmax: online lse
        else:
            # TODO(synk): grouped softmax with groups wider than max_group_tile
            # would need a per-group online lse; fall back to whole-group tiles.
            tn = last

    tb = _pick_tile(B, tb_pref, alignments=(256, 128, 8))
    tk = _pick_tile(F, tk_pref, alignments=(256, 128))

    if two_pass:
        pad_align = 256
        padded = ((flat_out + pad_align - 1) // pad_align) * pad_align
        tn = _pick_div_tile(padded, tn_pref, pad_align)
    else:
        padded = flat_out

    # ---- shrink tiles (tk first, then tb) to fit the per-generation budget ---
    def tiles_bytes(tb_, tn_, tk_):
        b = 2 * tb_ * tk_ * in_isz          # x tile, double-buffered
        b += 2 * tk_ * tn_ * w_isz          # weight tile, double-buffered
        b += 2 * tn_ * 4                    # bias tile
        b += tb_ * tn_ * 4                  # f32 accumulator
        if two_pass:
            b += 2 * tb_ * tn_ * 4          # f32 logits tile
            b += 4 * tb_ * 4                # lse output + (m, l) scratch
        else:
            b += 2 * tb_ * tn_ * out_isz    # output tile
        return b

    while tiles_bytes(tb, tn, tk) > tile_budget:
        if tk > 256:
            new_tk = _pick_tile(F, max(tk // 2, 256), alignments=(256, 128))
            if new_tk < tk:
                tk = new_tk
                continue
        if tb > 64:
            new_tb = _pick_tile(B, max(tb // 2, 64), alignments=(256, 128, 8))
            if new_tb < tb:
                tb = new_tb
                continue
        break

    n_i, n_j, n_k = B // tb, padded // tn, F // tk

    # Give the v7x megacore >= 2 parallel programs when shapes allow.
    if n_i * n_j == 1 and tb >= 16 and tb % 2 == 0 and B % (tb // 2) == 0:
        tb //= 2
        n_i = B // tb

    need = tiles_bytes(tb, tn, tk)
    vmem_limit = int(min(max(2 * need, 32 * 1024 * 1024), vmem_ceiling))

    x_reads = 1 if n_k == 1 else n_j        # x tile DMA skipped across j when tk == F

    # ==========================================================================
    # Path A: fused single-pass (whole softmax groups per output tile)
    # ==========================================================================
    if not two_pass:
        groups_per_tile = tn // last
        kernel = functools.partial(_fused_output_kernel,
                                   groups_per_tile=groups_per_tile, last=last,
                                   accum_bf16=use_bf16)
        cost = pl.CostEstimate(
            flops=int(2 * B * F * flat_out),
            transcendentals=int(B * flat_out),
            bytes_accessed=int(B * F * in_isz * x_reads
                               + flat_out * F * w_isz * n_i
                               + flat_out * 4 * n_i
                               + B * flat_out * out_isz),
        )
        out = pl.pallas_call(
            kernel,
            out_shape=jax.ShapeDtypeStruct((B, flat_out), out_dtype),
            grid=(n_i, n_j, n_k),
            in_specs=[
                pl.BlockSpec((tb, tk), lambda i, j, k: (i, k)),   # activations
                pl.BlockSpec((tk, tn), lambda i, j, k: (k, j)),   # weight (in, out)
                pl.BlockSpec((1, tn), lambda i, j, k: (0, j)),    # bias
            ],
            out_specs=pl.BlockSpec((tb, tn), lambda i, j, k: (i, j)),
            scratch_shapes=[pltpu.VMEM((tb, tn), jnp.float32)],
            compiler_params=pltpu.CompilerParams(
                dimension_semantics=("parallel", "parallel", "arbitrary"),
                vmem_limit_bytes=vmem_limit,
            ),
            cost_estimate=cost,
        )(x, w_t, bias.reshape(1, flat_out))

        if len(output_shape) > 1:
            out = out.reshape(B, *output_shape)
        return out

    # ==========================================================================
    # Path B: two-pass online-logsumexp (softmax row wider than the tile budget)
    # ==========================================================================
    if padded != flat_out:
        # Pad the vocab dim: zero weight columns + very negative bias so the
        # padded logits contribute exp(...) == 0 to the logsumexp.
        w_t = jnp.pad(w_t, ((0, 0), (0, padded - flat_out)))
        b_pad = jnp.pad(bias, (0, padded - flat_out), constant_values=_NEG_LARGE)
    else:
        b_pad = bias
    b2 = b_pad.reshape(1, padded)

    kernel1 = functools.partial(_logits_lse_kernel, accum_bf16=use_bf16)
    cost1 = pl.CostEstimate(
        flops=int(2 * B * F * padded),
        transcendentals=int(2 * B * padded),
        bytes_accessed=int(B * F * in_isz * x_reads
                           + padded * F * w_isz * n_i
                           + padded * 4 * n_i
                           + B * padded * 4 + B * 4),
    )
    logits, lse = pl.pallas_call(
        kernel1,
        out_shape=(jax.ShapeDtypeStruct((B, padded), jnp.float32),
                   jax.ShapeDtypeStruct((B, 1), jnp.float32)),
        grid=(n_i, n_j, n_k),
        in_specs=[
            pl.BlockSpec((tb, tk), lambda i, j, k: (i, k)),
            pl.BlockSpec((tk, tn), lambda i, j, k: (k, j)),
            pl.BlockSpec((1, tn), lambda i, j, k: (0, j)),
        ],
        out_specs=(pl.BlockSpec((tb, tn), lambda i, j, k: (i, j)),
                   pl.BlockSpec((tb, 1), lambda i, j, k: (i, 0))),
        scratch_shapes=[pltpu.VMEM((tb, tn), jnp.float32),   # matmul accumulator
                        pltpu.VMEM((tb, 1), jnp.float32),    # running max
                        pltpu.VMEM((tb, 1), jnp.float32)],   # running sum-exp
        compiler_params=pltpu.CompilerParams(
            # lse state accumulates across the j (vocab-tile) axis.
            dimension_semantics=("parallel", "arbitrary", "arbitrary"),
            vmem_limit_bytes=vmem_limit,
        ),
        cost_estimate=cost1,
    )(x, w_t, b2)

    out = pl.pallas_call(
        _subtract_lse_kernel,
        out_shape=jax.ShapeDtypeStruct((B, padded), out_dtype),
        grid=(n_i, n_j),
        in_specs=[pl.BlockSpec((tb, tn), lambda i, j: (i, j)),
                  pl.BlockSpec((tb, 1), lambda i, j: (i, 0))],
        out_specs=pl.BlockSpec((tb, tn), lambda i, j: (i, j)),
        compiler_params=pltpu.CompilerParams(
            dimension_semantics=("parallel", "parallel"),
            vmem_limit_bytes=vmem_limit,
        ),
    )(logits, lse)

    out = out[:, :flat_out]
    if len(output_shape) > 1:
        out = out.reshape(B, *output_shape)
    return out


# --------------------------------------------------------------------------
# Reference + tests
# --------------------------------------------------------------------------
def _reference(x, weight, bias, output_shape):
    if not isinstance(output_shape, (list, tuple)):
        output_shape = [output_shape]
    h = x @ weight.T + bias
    if len(output_shape) > 1:
        h = h.reshape(h.shape[0], *output_shape)
    return jax.nn.log_softmax(h, axis=-1)


def _make_inputs(key, B, F, flat_out, dtype=jnp.float32):
    kx, kw, kb = jax.random.split(key, 3)
    x = jax.random.normal(kx, (B, F), dtype=dtype)
    bound = 1.0 / np.sqrt(F)
    weight = jax.random.uniform(kw, (flat_out, F), minval=-bound, maxval=bound,
                                dtype=dtype)
    bias = jax.random.uniform(kb, (flat_out,), minval=-bound, maxval=bound,
                              dtype=dtype)
    return x, weight, bias


if __name__ == "__main__":
    key = jax.random.PRNGKey(0)
    k1, k2, k3 = jax.random.split(key, 3)

    # Test 1: module example shapes: batch=8, in_features=32, output_shape=(4,16)
    # -> grouped log_softmax over the trailing 16 (tile-local path).
    B, F = 8, 32
    output_shape = (4, 16)
    flat_out = int(np.prod(output_shape))
    x, weight, bias = _make_inputs(k1, B, F, flat_out)
    out = jax.block_until_ready(output_layer_forward(x, weight, bias, output_shape))
    ref = _reference(x, weight, bias, output_shape)
    np.testing.assert_allclose(np.asarray(out), np.asarray(ref),
                               atol=1e-5, rtol=1e-5)
    assert out.shape == (B,) + output_shape

    # Test 2: 1-D output_shape (vocab-style softmax) with a tiled K axis to
    # exercise the f32 accumulator path (tk_pref=128 -> K grid of 2).
    B2, F2, V2 = 16, 256, 256
    x2, w2, b2 = _make_inputs(k2, B2, F2, V2)
    out2 = jax.block_until_ready(output_layer_forward(x2, w2, b2, V2, tk_pref=128))
    ref2 = _reference(x2, w2, b2, V2)
    np.testing.assert_allclose(np.asarray(out2), np.asarray(ref2),
                               atol=5e-5, rtol=5e-5)
    assert out2.shape == (B2, V2)

    # Test 3: wide (non-tile-resident, non-128-multiple) softmax row -> forces
    # the two-pass online-logsumexp path with vocab padding.
    B3, F3, V3 = 16, 128, 1000
    x3, w3, b3 = _make_inputs(k3, B3, F3, V3)
    out3 = jax.block_until_ready(
        output_layer_forward(x3, w3, b3, V3, tn_pref=256, max_group_tile=256))
    ref3 = _reference(x3, w3, b3, V3)
    np.testing.assert_allclose(np.asarray(out3), np.asarray(ref3),
                               atol=5e-5, rtol=5e-5)
    assert out3.shape == (B3, V3)

    print("KERNEL_OK")
</pallas_src>

<mosaic_0001>
module attributes {stable_mosaic.version = 11 : i64} {
  func.func @_fused_output_kernel(%arg0: i32, %arg1: i32, %arg2: i32, %arg3: memref<8x32xf32, #tpu.memory_space<vmem>>, %arg4: memref<32x64xf32, #tpu.memory_space<vmem>>, %arg5: memref<1x64xf32, #tpu.memory_space<vmem>>, %arg6: memref<8x64xf32, #tpu.memory_space<vmem>>, %arg7: memref<8x64xf32, #tpu.memory_space<vmem>>) attributes {dimension_semantics = [#tpu.dimension_semantics<parallel>, #tpu.dimension_semantics<parallel>, #tpu.dimension_semantics<arbitrary>], iteration_bounds = array<i64: 1, 1, 1>, scalar_prefetch = 0 : i64, scratch_operands = 1 : i64, tpu.core_type = #tpu.core_type<tc>, window_params = [{transform_indices = @transform_0, window_bounds = array<i64: 8, 32>}, {transform_indices = @transform_1, window_bounds = array<i64: 32, 64>}, {transform_indices = @transform_2, window_bounds = array<i64: 1, 64>}, {transform_indices = @transform_3, window_bounds = array<i64: 8, 64>}]} {
    %c0_i32 = arith.constant 0 : i32
    %0 = arith.cmpi eq, %arg2, %c0_i32 : i32
    %1 = arith.extui %0 : i1 to i32
    %c0_i32_0 = arith.constant 0 : i32
    %2 = arith.cmpi ne, %1, %c0_i32_0 : i32
    scf.if %2 {
      %cst_10 = arith.constant 0.000000e+00 : f32
      %12 = vector.broadcast %cst_10 : f32 to vector<8x64xf32>
      %c0_11 = arith.constant 0 : index
      %c0_12 = arith.constant 0 : index
      %13 = vector.load %arg7[%c0_11, %c0_12] : memref<8x64xf32, #tpu.memory_space<vmem>>, vector<8x64xf32>
      tpu.vector_store %arg7[%c0_11, %c0_12], %12 {strides = array<i32>} : memref<8x64xf32, #tpu.memory_space<vmem>>, vector<8x64xf32>,
    } else {
    }
    %c0 = arith.constant 0 : index
    %c0_1 = arith.constant 0 : index
    %3 = vector.load %arg3[%c0, %c0_1] : memref<8x32xf32, #tpu.memory_space<vmem>>, vector<8x32xf32>
    %c0_2 = arith.constant 0 : index
    %c0_3 = arith.constant 0 : index
    %4 = vector.load %arg4[%c0_2, %c0_3] : memref<32x64xf32, #tpu.memory_space<vmem>>, vector<32x64xf32>
    %c0_4 = arith.constant 0 : index
    %c0_5 = arith.constant 0 : index
    %5 = vector.load %arg7[%c0_4, %c0_5] : memref<8x64xf32, #tpu.memory_space<vmem>>, vector<8x64xf32>
    %cst = arith.constant dense<0.000000e+00> : vector<8x64xf32>
    %6 = tpu.matmul %3, %4, %cst {dimension_numbers = #tpu.dot_dimension_numbers<[1], [0], [0], [1], [0, 0, 1, 1], [], []>} : vector<8x32xf32>, vector<32x64xf32>, vector<8x64xf32> -> vector<8x64xf32>
    %7 = arith.addf %5, %6 : vector<8x64xf32>
    %c0_6 = arith.constant 0 : index
    %c0_7 = arith.constant 0 : index
    %8 = vector.load %arg7[%c0_6, %c0_7] : memref<8x64xf32, #tpu.memory_space<vmem>>, vector<8x64xf32>
    tpu.vector_store %arg7[%c0_6, %c0_7], %7 {strides = array<i32>} : memref<8x64xf32, #tpu.memory_space<vmem>>, vector<8x64xf32>,
    %c0_i32_8 = arith.constant 0 : i32
    %9 = arith.cmpi eq, %arg2, %c0_i32_8 : i32
    %10 = arith.extui %9 : i1 to i32
    %c0_i32_9 = arith.constant 0 : i32
    %11 = arith.cmpi ne, %10, %c0_i32_9 : i32
    scf.if %11 {
      %c0_10 = arith.constant 0 : index
      %c0_11 = arith.constant 0 : index
      %12 = vector.load %arg7[%c0_10, %c0_11] : memref<8x64xf32, #tpu.memory_space<vmem>>, vector<8x64xf32>
      %c0_12 = arith.constant 0 : index
      %c0_13 = arith.constant 0 : index
      %13 = vector.load %arg5[%c0_12, %c0_13] : memref<1x64xf32, #tpu.memory_space<vmem>>, vector<1x64xf32>
      %14 = vector.broadcast %13 : vector<1x64xf32> to vector<8x64xf32>
      %15 = arith.addf %12, %14 : vector<8x64xf32>
      %16 = vector.shape_cast %15 : vector<8x64xf32> to vector<8x4x16xf32>
      %cst_14 = arith.constant dense<0xFF800000> : vector<8x4xf32>
      %17 = vector.multi_reduction <maximumf>, %16, %cst_14 [2] : vector<8x4x16xf32> to vector<8x4xf32>
      %18 = vector.shape_cast %17 : vector<8x4xf32> to vector<8x4x1xf32>
      %19 = vector.broadcast %18 : vector<8x4x1xf32> to vector<8x4x16xf32>
      %20 = arith.subf %16, %19 : vector<8x4x16xf32>
      %21 = math.exp %20 : vector<8x4x16xf32>
      %cst_15 = arith.constant dense<0.000000e+00> : vector<8x4xf32>
      %22 = vector.multi_reduction <add>, %21, %cst_15 [2] : vector<8x4x16xf32> to vector<8x4xf32>
      %23 = vector.shape_cast %22 : vector<8x4xf32> to vector<8x4x1xf32>
      %24 = math.log %23 : vector<8x4x1xf32>
      %25 = vector.broadcast %24 : vector<8x4x1xf32> to vector<8x4x16xf32>
      %26 = arith.subf %20, %25 : vector<8x4x16xf32>
      %27 = vector.shape_cast %26 : vector<8x4x16xf32> to vector<8x64xf32>
      %c0_16 = arith.constant 0 : index
      %c0_17 = arith.constant 0 : index
      %28 = vector.load %arg6[%c0_16, %c0_17] : memref<8x64xf32, #tpu.memory_space<vmem>>, vector<8x64xf32>
      tpu.vector_store %arg6[%c0_16, %c0_17], %27 {strides = array<i32>} : memref<8x64xf32, #tpu.memory_space<vmem>>, vector<8x64xf32>,
    } else {
    }
    return
  }
  func.func @transform_0(%arg0: i32, %arg1: i32, %arg2: i32) -> (i32, i32) {
    %c0_i32 = arith.constant 0 : i32
    return %arg0, %arg2 : i32, i32
  }
  func.func @transform_1(%arg0: i32, %arg1: i32, %arg2: i32) -> (i32, i32) {
    %c0_i32 = arith.constant 0 : i32
    return %arg2, %arg1 : i32, i32
  }
  func.func @transform_2(%arg0: i32, %arg1: i32, %arg2: i32) -> (i32, i32) {
    %c0_i32 = arith.constant 0 : i32
    %c0_i32_0 = arith.constant 0 : i32
    return %c0_i32, %arg1 : i32, i32
  }
  func.func @transform_3(%arg0: i32, %arg1: i32, %arg2: i32) -> (i32, i32) {
    %c0_i32 = arith.constant 0 : i32
    return %arg0, %arg1 : i32, i32
  }
}

</mosaic_0001>

<bundles_post_ra>
// kernel: tpu_custom_call.1
= control target key start
LH: loop header
LB: loop body
LE: loop exit
PB: predicated region body
PF: predicated region fallthrough
CT: control target
= control target key end

     0   :  { %8 = vsyncpa [#allocation4], 0  ;;  %s680_s0 = inlined_call_operand.hbm [shape: f32[8,32], index: 0, kind: input, shape index: {}]   ;;  %s681_s1 = inlined_call_operand.hbm [shape: f32[32,64], index: 1, kind: input, shape index: {}]   ;;  %s682_s2 = inlined_call_operand.vmem [shape: f32[1,64], index: 2, kind: input, shape index: {}]   ;;  %s683_s3 = inlined_call_operand.hbm [shape: f32[8,64], index: 3, kind: output, shape index: {}]  }
   0x1   :  { %9 = vsyncpa [#allocation7], 0 }
   0x2   :  { %10 = vsyncpa [#allocation5], 0  ;;  %s550_s12 = smov [#allocation3]   ;;  %s551_s14 = smov [#allocation6]  }
   0x3   :  { %s17_s13 = sshll.u32 %s550_s12, 4  ;;  %s26_s15 = sshll.u32 %s551_s14, 4  ;;  %s18_s13 = int_to_ptr.vmem [resolvable:$true] %s17_s13  ;;  %s27_s15 = int_to_ptr.vmem [resolvable:$true] %s26_s15 }
   0x4   :  { %s492_s16 = scalar_lea.vmem %s18_s13, 128  ;;  %p497_p1 = scmp.lt.s32.totalorder %s18_s13, %s18_s13 }
   0x5   :  { %p493_p0 = scmp.ne.s32.totalorder %s18_s13, %s492_s16  ;;  %p498_p2 = scmp.lt.s32.totalorder %s492_s16, %s492_s16 }
   0x7   :  { %p499_p3 = por %p498_p2, %p497_p1 }
   0x9   :  { %p500_p4 = pnand %p499_p3, %p493_p0 }
   0xb   :  { %503 = shalt.err (!%p500_p4)
}
   0xc   :  { %20 = dma.hbm_to_vmem [thread:$0]  %s680_s0, 128, %s18_s13, [#allocation4]  }
   0xd   :  { %s512_s19 = scalar_lea.vmem %s27_s15, 512  ;;  %p517_p6 = scmp.lt.s32.totalorder %s27_s15, %s27_s15 }
   0xe   :  { %p513_p5 = scmp.ne.s32.totalorder %s27_s15, %s512_s19  ;;  %p518_p7 = scmp.lt.s32.totalorder %s512_s19, %s512_s19 }
  0x10   :  { %p519_p8 = por %p518_p7, %p517_p6 }
  0x12   :  { %p520_p9 = pnand %p519_p8, %p513_p5 }
  0x14   :  { %523 = shalt.err (!%p520_p9)
}
  0x15   :  { %s552_s20 = smov 128   ;;  %s553_s21 = smov 8  }
  0x16   :  { %32 = dma.hbm_to_vmem [thread:$0]  %s681_s1, 512, %s27_s15, [#allocation7], %s552_s20, %s552_s20, %s553_s21  }
  0x17   :  { %544 = dma.done.wait [#allocation4], 128  }
  0x18   :  { %545 = vsyncadd [#allocation4], 4294967168 }
  0x19   :  { %546 = dma.done.wait [#allocation7], 512  }
  0x1a   :  { %547 = vsyncadd [#allocation7], 4294966784  ;;  %vm45_vm0 = vcmask 523264   ;;  %v554_v0 = vmov 0.0   ;;  %vm555_vm1 = vmmov 0   ;;  %v51_v1 = vld [vmem:[#allocation6 + $0x18] sm:$0xff]  ;;  %v157_v15 = vlaneseq }
  0x1b   :  { %426 = vmatprep.subr.mxu0 %v554_v0  ;;  %434 = vmatprep.mubr.msk.f32.mxu0 %vm555_vm1, %v554_v0  ;;  %46 = vst.msk [vmem:[#allocation2] sm:$0xff] %vm45_vm0, %v554_v0  ;;  %v50_v2 = vld [vmem:[#allocation6 + $0x10] sm:$0xff]  ;;  %v49_v3 = vld [vmem:[#allocation6 + $0x8] sm:$0xff]  ;;  %v48_v4 = vld [vmem:[#allocation6] sm:$0xff]  ;;  %vm53_vm2 = vcmask 261120   ;;  %s556_s24 = smov 80  }
  0x1c   :  { %427 = vmatpush3.msra.mxu0 %v51_v1  ;;  %v47_v5 = vld [vmem:[#allocation3] sm:$0xff]  ;;  %v420_v10 = vld [vmem:[%s682_s2] ss:$0 sm:$0xff]  ;;  %s557_s25 = smov 112   ;;  %s558_s26 = smov 96   ;;  %v158_v19 = vshrl.u32 %v157_v15, 7 }
  0x1d   :  { %428 = vmatprep.subr.mxu0 %v554_v0  ;;  %v559_v13 = vmov 1983009808   ;;  %v560_v16 = vmov 1934713408   ;;  %vm220_vm3 = vcmask 125952   ;;  %s561_s2 = smov 32  }
  0x1e   :  { %429 = vmatpush3.msra.mxu0 %v50_v2  ;;  %v155_v14 = vunpack.c.l.s4 %v559_v13  ;;  %v187_v17 = vunpack.c.l.s4 %v560_v16  ;;  %s562_s27 = smov 16   ;;  %s563_s28 = smov 48   ;;  %vm397_vm4 = vcmask 130048   ;;  %vm400_vm5 = vcmask 392192  }
  0x1f   :  { %430 = vmatprep.subr.mxu0 %v554_v0  ;;  %s564_s29 = smov [#allocation8]  }
  0x20   :  { %431 = vmatpush3.msra.mxu0 %v49_v3  ;;  %v156_v18 = vunpack.c.0.s8 %v155_v14  ;;  %v188_v22 = vunpack.c.0.s8 %v187_v17  ;;  %s409_s30 = sshll.u32 %s564_s29, 4  ;;  %s410_s30 = int_to_ptr.vmem [resolvable:$true] %s409_s30 }
  0x21   :  { %432 = vmatprep.subr.mxu0 %v554_v0  ;;  %s524_s4 = scalar_lea.vmem %s410_s30, 128  ;;  %p529_p11 = scmp.lt.s32.totalorder %s410_s30, %s410_s30 }
  0x22   :  { %433 = vmatpush3.msra.mxu0 %v48_v4  ;;  %v52_v6 = vld [vmem:[#allocation2] sm:$0xff]  ;;  %v603_v23 = vsub.s32 %v156_v18, %v158_v19  ;;  %v605_v29 = vsub.s32 %v188_v22, %v158_v19  ;;  %p525_p10 = scmp.ne.s32.totalorder %s410_s30, %s524_s4  ;;  %p530_p12 = scmp.lt.s32.totalorder %s524_s4, %s524_s4 }
  0x23   :  { %435 = vmatmul.mubr.msk.f32.vlgmr.msra.gmra.mxu0 %vm53_vm2, %v47_v5 }
  0x24   :  { %p531_p13 = por %p530_p12, %p529_p11 }
  0x26   :  { %p532_p0 = pnand %p531_p13, %p525_p10 }
  0xe3   :  { %v123_v7 = vpop.f32.mrf.mxu0 }
  0xe4   :  { %v127_v8 = vadd.f32 %v123_v7, %v52_v6 }
  0xe5   :  { %v436_v9 = vpop.f32.mrf.mxu0 }
  0xe6   :  { %129 = vst.msk [vmem:[#allocation2] sm:$0xff] %vm45_vm0, %v127_v8 }
  0xed   :  { %v133_v11 = vld [vmem:[#allocation2] sm:$0xff] }
  0xee   :  { %v141_v12 = vadd.f32 %v420_v10, %v133_v11 }
  0xf0   :  { %149 = vrot.lane.b32.xlu1 %v141_v12, %s556_s24  ;;  %143 = vrot.lane.b32.xlu0 %v141_v12, %s557_s25 }
  0xf4   :  { %146 = vrot.lane.b32.xlu0 %v141_v12, %s558_s26 }
 0x162   :  { %v150_v20 = vpop.permute.xlu1 %149  ;;  %v144_v21 = vpop.permute.xlu0 %143 }
 0x163   :  { %v168_v24 = vcombine.low %v144_v21, %v150_v20  ;;  %v169_v25 = vcombine.high %v144_v21, %v150_v20 }
 0x165   :  { %v176_v30 = vrot.slane %v168_v24, %v603_v23  ;;  %v183_v31 = vrot.slane %v169_v25, %v603_v23 }
 0x166   :  { %v147_v26 = vpop.permute.xlu0 %146 }
 0x167   :  { %v152_v27 = vcombine.low %v141_v12, %v147_v26  ;;  %v153_v28 = vcombine.high %v141_v12, %v147_v26 }
 0x169   :  { %v160_v32 = vrot.slane %v152_v27, %v603_v23  ;;  %v167_v33 = vrot.slane %v153_v28, %v603_v23 }
 0x16b   :  { %v184_v34 = vcombine.low %v160_v32, %v176_v30  ;;  %v185_v35 = vcombine.high %v160_v32, %v176_v30  ;;  %v200_v36 = vcombine.low %v167_v33, %v183_v31  ;;  %v201_v39 = vcombine.high %v167_v33, %v183_v31 }
 0x16d   :  { %v199_v37 = vrot.slane %v185_v35, %v605_v29  ;;  %v192_v38 = vrot.slane %v184_v34, %v605_v29  ;;  %v208_v42 = vrot.slane %v200_v36, %v605_v29  ;;  %v215_v44 = vrot.slane %v201_v39, %v605_v29 }
 0x16f   :  { %v227_v40 = vsel %vm220_vm3, %v199_v37, -inf  ;;  %v221_v41 = vsel %vm220_vm3, %v192_v38, -inf  ;;  %v217_v43 = vcombine.high %v199_v37, %v554_v0  ;;  %v233_v45 = vsel %vm220_vm3, %v208_v42, -inf }
 0x170   :  { %228 = vmax.xlane.f32.xlu0 %v227_v40  ;;  %222 = vmax.xlane.f32.xlu1 %v221_v41  ;;  %v218_v47 = vcombine.high %v208_v42, %v554_v0  ;;  %v216_v48 = vcombine.high %v192_v38, %v554_v0  ;;  %v219_v51 = vcombine.high %v215_v44, %v554_v0  ;;  %v239_v53 = vsel %vm220_vm3, %v215_v44, -inf }
 0x171   :  { %v230_v46 = vsel %vm220_vm3, %v217_v43, -inf }
 0x172   :  { %v236_v49 = vsel %vm220_vm3, %v218_v47, -inf  ;;  %v224_v50 = vsel %vm220_vm3, %v216_v48, -inf  ;;  %v242_v52 = vsel %vm220_vm3, %v219_v51, -inf }
 0x174   :  { %234 = vmax.xlane.f32.xlu0 %v233_v45  ;;  %231 = vmax.xlane.f32.xlu1 %v230_v46 }
 0x178   :  { %237 = vmax.xlane.f32.xlu1 %v236_v49  ;;  %225 = vmax.xlane.f32.xlu0 %v224_v50 }
 0x17c   :  { %243 = vmax.xlane.f32.xlu1 %v242_v52  ;;  %240 = vmax.xlane.f32.xlu0 %v239_v53 }
 0x1f9   :  { %v229_v54 = vpop.xlane.xlu0 %228  ;;  %v223_v55 = vpop.xlane.xlu1 %222 }
 0x1fa   :  { %v627_v56 = vsub.f32 %v199_v37, %v229_v54  ;;  %v629_v57 = vsub.f32 %v192_v38, %v223_v55 }
 0x1fc   :  { %v253_v58 = vmul.f32 1.442695, %v629_v57  ;;  %v257_v59 = vmul.f32 1.442695, %v627_v56 }
 0x1fd   :  { %v235_v60 = vpop.xlane.xlu0 %234  ;;  %v232_v61 = vpop.xlane.xlu1 %231 }
 0x1fe   :  { %v633_v62 = vsub.f32 %v208_v42, %v235_v60  ;;  %452 = vpow2.f32 %v253_v58  ;;  %v636_v0 = vsub.f32 %v217_v43, %v232_v61 }
 0x1ff   :  { %454 = vpow2.f32 %v257_v59 }
 0x200   :  { %v261_v63 = vmul.f32 1.442695, %v633_v62  ;;  %v259_v5 = vmul.f32 1.442695, %v636_v0 }
 0x201   :  { %v238_v1 = vpop.xlane.xlu1 %237  ;;  %v226_v2 = vpop.xlane.xlu0 %225 }
 0x202   :  { %v638_v3 = vsub.f32 %v216_v48, %v226_v2  ;;  %456 = vpow2.f32 %v261_v63  ;;  %v642_v6 = vsub.f32 %v218_v47, %v238_v1 }
 0x204   :  { %v255_v4 = vmul.f32 1.442695, %v638_v3  ;;  %v263_v11 = vmul.f32 1.442695, %v642_v6 }
 0x205   :  { %v241_v7 = vpop.xlane.xlu0 %240  ;;  %v244_v8 = vpop.xlane.xlu1 %243 }
 0x206   :  { %v644_v9 = vsub.f32 %v215_v44, %v241_v7  ;;  %458 = vpow2.f32 %v255_v4  ;;  %v648_v12 = vsub.f32 %v219_v51, %v244_v8 }
 0x207   :  { %460 = vpow2.f32 %v259_v5 }
 0x208   :  { %v265_v10 = vmul.f32 1.442695, %v644_v9  ;;  %v267_v14 = vmul.f32 1.442695, %v648_v12 }
 0x20a   :  { %462 = vpow2.f32 %v265_v10 }
 0x20b   :  { %v453_v13 = vpop.eup %452  ;;  %464 = vpow2.f32 %v263_v11 }
 0x20c   :  { %v269_v15 = vsel %vm220_vm3, %v453_v13, 0.0  ;;  %v455_v16 = vpop.eup %454  ;;  %466 = vpow2.f32 %v267_v14 }
 0x20d   :  { %270 = vadd.xlane.f32.xlu0 %v269_v15  ;;  %v275_v17 = vsel %vm220_vm3, %v455_v16, 0.0 }
 0x20f   :  { %v457_v18 = vpop.eup %456 }
 0x210   :  { %v281_v20 = vsel %vm220_vm3, %v457_v18, 0.0 }
 0x211   :  { %276 = vadd.xlane.f32.xlu0 %v275_v17 }
 0x213   :  { %v459_v19 = vpop.eup %458 }
 0x214   :  { %v272_v21 = vsel %vm220_vm3, %v459_v19, 0.0  ;;  %v461_v22 = vpop.eup %460 }
 0x215   :  { %282 = vadd.xlane.f32.xlu0 %v281_v20  ;;  %273 = vadd.xlane.f32.xlu1 %v272_v21  ;;  %v278_v25 = vsel %vm220_vm3, %v461_v22, 0.0 }
 0x217   :  { %v463_v24 = vpop.eup %462 }
 0x218   :  { %v287_v26 = vsel %vm220_vm3, %v463_v24, 0.0  ;;  %v465_v27 = vpop.eup %464 }
 0x219   :  { %279 = vadd.xlane.f32.xlu1 %v278_v25  ;;  %288 = vadd.xlane.f32.xlu0 %v287_v26  ;;  %v284_v28 = vsel %vm220_vm3, %v465_v27, 0.0  ;;  %v467_v30 = vpop.eup %466 }
 0x21a   :  { %v290_v31 = vsel %vm220_vm3, %v467_v30, 0.0 }
 0x21d   :  { %285 = vadd.xlane.f32.xlu1 %v284_v28 }
 0x221   :  { %291 = vadd.xlane.f32.xlu1 %v290_v31 }
 0x296   :  { %v271_v32 = vpop.xlane.xlu0 %270 }
 0x29a   :  { %v277_v33 = vpop.xlane.xlu0 %276 }
 0x29b   :  { %468 = vlog2.f32 %v277_v33 }
 0x29e   :  { %v274_v34 = vpop.xlane.xlu1 %273  ;;  %v283_v35 = vpop.xlane.xlu0 %282 }
 0x29f   :  { %470 = vlog2.f32 %v274_v34 }
 0x2a0   :  { %472 = vlog2.f32 %v271_v32 }
 0x2a2   :  { %v280_v36 = vpop.xlane.xlu1 %279  ;;  %v289_v37 = vpop.xlane.xlu0 %288 }
 0x2a3   :  { %474 = vlog2.f32 %v280_v36 }
 0x2a4   :  { %476 = vlog2.f32 %v289_v37 }
 0x2a5   :  { %478 = vlog2.f32 %v283_v35 }
 0x2a6   :  { %v286_v38 = vpop.xlane.xlu1 %285 }
 0x2a7   :  { %480 = vlog2.f32 %v286_v38 }
 0x2a8   :  { %v469_v40 = vpop.eup %468 }
 0x2a9   :  { %v298_v45 = vmul.f32 0.6931472, %v469_v40 }
 0x2aa   :  { %v292_v39 = vpop.xlane.xlu1 %291 }
 0x2ab   :  { %482 = vlog2.f32 %v292_v39  ;;  %v311_v53 = vsub.f32 %v627_v56, %v298_v45 }
 0x2ac   :  { %v471_v41 = vpop.eup %470 }
 0x2ad   :  { %v473_v42 = vpop.eup %472  ;;  %v296_v46 = vmul.f32 0.6931472, %v471_v41 }
 0x2ae   :  { %v294_v49 = vmul.f32 0.6931472, %v473_v42 }
 0x2af   :  { %v310_v54 = vsub.f32 %v638_v3, %v296_v46 }
 0x2b0   :  { %v475_v43 = vpop.eup %474  ;;  %v309_v58 = vsub.f32 %v629_v57, %v294_v49 }
 0x2b1   :  { %v477_v44 = vpop.eup %476  ;;  %v300_v47 = vmul.f32 0.6931472, %v475_v43 }
 0x2b2   :  { %v479_v48 = vpop.eup %478  ;;  %v306_v51 = vmul.f32 0.6931472, %v477_v44  ;;  %v317_v1 = vcombine.low %v309_v58, %v311_v53 }
 0x2b3   :  { %v312_v50 = vsub.f32 %v636_v0, %v300_v47  ;;  %v302_v55 = vmul.f32 0.6931472, %v479_v48 }
 0x2b4   :  { %v481_v52 = vpop.eup %480  ;;  %v315_v60 = vsub.f32 %v644_v9, %v306_v51  ;;  %v324_v8 = vrot.slane %v317_v1, %v603_v23 }
 0x2b5   :  { %v325_v59 = vcombine.low %v310_v54, %v312_v50  ;;  %v304_v61 = vmul.f32 0.6931472, %v481_v52  ;;  %v313_v2 = vsub.f32 %v633_v62, %v302_v55 }
 0x2b7   :  { %v333_v5 = vcombine.low %v313_v2, %v315_v60  ;;  %v314_v0 = vsub.f32 %v642_v6, %v304_v61  ;;  %v332_v56 = vrot.slane %v325_v59, %v603_v23 }
 0x2b8   :  { %v483_v63 = vpop.eup %482 }
 0x2b9   :  { %v308_v4 = vmul.f32 0.6931472, %v483_v63  ;;  %v340_v57 = vrot.slane %v333_v5, %v603_v23  ;;  %v350_v10 = vcombine.high %v324_v8, %v332_v56  ;;  %v349_v11 = vcombine.low %v324_v8, %v332_v56 }
 0x2bb   :  { %v316_v7 = vsub.f32 %v648_v12, %v308_v4  ;;  %v364_v62 = vrot.slane %v350_v10, %v605_v29  ;;  %v357_v6 = vrot.slane %v349_v11, %v605_v29 }
 0x2bd   :  { %v341_v3 = vcombine.low %v314_v0, %v316_v7 }
 0x2bf   :  { %v348_v9 = vrot.slane %v341_v3, %v603_v23 }
 0x2c1   :  { %v366_v13 = vcombine.high %v340_v57, %v348_v9  ;;  %v365_v14 = vcombine.low %v340_v57, %v348_v9 }
 0x2c3   :  { %v380_v15 = vrot.slane %v366_v13, %v605_v29  ;;  %v373_v12 = vrot.slane %v365_v14, %v605_v29 }
 0x2c5   :  { %v383_v16 = vcombine.low %v364_v62, %v380_v15  ;;  %v382_v17 = vcombine.high %v357_v6, %v373_v12  ;;  %v381_v18 = vcombine.low %v357_v6, %v373_v12  ;;  %v384_v23 = vcombine.high %v364_v62, %v380_v15 }
 0x2c7   :  { %390 = vrot.lane.b32.xlu1 %v383_v16, %s561_s2  ;;  %386 = vrot.lane.b32.xlu0 %v382_v17, %s562_s27 }
 0x2cb   :  { %394 = vrot.lane.b32.xlu1 %v384_v23, %s563_s28 }
 0x339   :  { %v391_v19 = vpop.permute.xlu1 %390  ;;  %v387_v20 = vpop.permute.xlu0 %386 }
 0x33a   :  { %v398_v21 = vsel %vm397_vm4, %v381_v18, %v387_v20 }
 0x33b   :  { %v399_v29 = vsel %vm53_vm2, %v398_v21, %v391_v19 }
 0x33d   :  { %v395_v22 = vpop.permute.xlu1 %394 }
 0x33e   :  { %v401_v24 = vsel %vm400_vm5, %v399_v29, %v395_v22 }
 0x33f   :  { %402 = vst.msk [vmem:[#allocation8] sm:$0xff] %vm45_vm0, %v401_v24 }
 0x340   :  { %535 = shalt.err (!%p532_p0)
}
 0x341   :  { %412 = dma.vmem_to_hbm [thread:$0]  %s410_s30, 128, %s683_s3, [#allocation5]  }
 0x342   :  { %548 = dma.done.wait [#allocation5], 128  }
 0x343   :  { %549 = vsyncadd [#allocation5], 4294967168 }
 0x344   :  { %416 = vsyncpa [#allocation4], 1 }
 0x345   :  { %417 = vsyncpa [#allocation7], 1 }
 0x346   :  { %418 = vsyncpa [#allocation5], 1 }

</bundles_post_ra>
